<compile_context>
chip_gen: v7x
topology: tpu7x:2x2x1
jax: 0.10.0
libtpu: 0.0.40
codegen_flags: <defaults>
</compile_context>

<pallas_src>
import jax
import jax.numpy as jnp
import numpy as np
from jax import lax
from jax.experimental import pallas as pl
from jax.experimental.pallas import tpu as pltpu

# ----------------------- problem configuration -----------------------------
B = 8            # batch (chosen so B*T == 128 -> lane-dense slabs)
C_IN = 16        # in_channels
C_OUT = 32       # out_channels
T = 16           # sequence length
K = 3            # depthwise kernel_size
STRIDE = 1       # depthwise stride
PAD = 1          # depthwise padding (padding_mode='zeros')
K_ATT = 3        # ECA attention kernel size ('eca_3')
T_OUT = (T + 2 * PAD - K) // STRIDE + 1
BT = B * T       # folded lane extent (multiple of 128)


# ----------------------------- Pallas kernel --------------------------------
def separable_cnn1d_kernel(x_ref, wp_ref, bp_ref, eca_ref, wd_ref, bd_ref,
                           pm_ref, o_ref, xs_ref):
    # x_ref:   (B, C_IN, T)     input                                [VMEM]
    # wp_ref:  (C_OUT, C_IN)    pointwise conv weight                [VMEM]
    # bp_ref:  (C_OUT, 1)       pointwise conv bias                  [VMEM]
    # eca_ref: (K_ATT,)         ECA conv taps (scalars)              [SMEM]
    # wd_ref:  (C_OUT, K)       depthwise conv weight                [VMEM]
    # bd_ref:  (C_OUT, 1)       depthwise conv bias                  [VMEM]
    # pm_ref:  (BT, BT)         block-mean matrix (1/T per batch blk)[VMEM]
    # o_ref:   (B, C_OUT, T_OUT) output                              [VMEM]
    # xs_ref:  (C_IN, BT)       scratch: batch folded into lanes     [VMEM]

    # ---- fold batch into lanes via static ref slices (zero-cost views) ----
    for b in range(B):                                   # static, small B
        xs_ref[:, b * T:(b + 1) * T] = x_ref[b]

    # ---- pointwise conv (kernel_size=1) == one lane-dense MXU matmul ----
    y = jnp.dot(wp_ref[...], xs_ref[...],
                preferred_element_type=jnp.float32)      # (C_OUT, BT)
    y = y + bp_ref[...]

    # ---- EfficientChannelAttention (spatial_channels=1, mask=None) ----
    # per-batch mean over time broadcast back onto that batch's lanes,
    # computed as a single matmul on the otherwise-idle MXU.
    pooled = jnp.dot(y, pm_ref[...],
                     preferred_element_type=jnp.float32)  # (C_OUT, BT)

    # 1-D conv over the channel (sublane) axis, zero padded: XLU roll + mask.
    half = (K_ATT - 1) // 2
    ch = lax.broadcasted_iota(jnp.int32, (C_OUT, 1), 0)   # (C_OUT, 1)
    att = eca_ref[half] * pooled                          # d == 0 tap, no mask
    for k in range(K_ATT):                                # static unroll
        if k == half:
            continue
        d = k - half                                      # channel offset
        shifted = pltpu.roll(pooled, shift=(-d) % C_OUT, axis=0)
        valid = jnp.logical_and(ch + d >= 0, ch + d < C_OUT)
        att = att + eca_ref[k] * jnp.where(valid, shifted, 0.0)
    att = jax.nn.sigmoid(att)

    # post_scale: channels / sum over channels (per batch; att is constant
    # along each batch's time lanes, so a sublane-sum is already per batch).
    ch_sum = jnp.sum(att, axis=0, keepdims=True)          # (1, BT)
    att = att * (jnp.float32(C_OUT) * pl.reciprocal(ch_sum, approx=True))
    y = y * att                                           # (C_OUT, BT)

    # ---- depthwise conv (groups=C_OUT), zero padding, via lane rolls ----
    t_idx = lax.broadcasted_iota(jnp.int32, (1, BT), 1) % T   # (1, BT)
    out = jnp.broadcast_to(bd_ref[...], (C_OUT, BT)).astype(jnp.float32)
    for k in range(K):                                    # static unroll
        d = k - PAD                                       # time offset
        if d == 0:
            out = out + wd_ref[:, k:k + 1] * y            # no mask needed
        else:
            shifted = pltpu.roll(y, shift=(-d) % BT, axis=1)   # y[:, j + d]
            valid = jnp.logical_and(t_idx + d >= 0, t_idx + d < T)
            out = out + wd_ref[:, k:k + 1] * jnp.where(valid, shifted, 0.0)

    # ---- unfold lanes back to (B, C_OUT, T_OUT) with static slices ----
    for b in range(B):
        o_ref[b] = out[:, b * T_OUT:(b + 1) * T_OUT].astype(o_ref.dtype)


@jax.jit
def separable_cnn1d(x, w_p, b_p, w_eca, w_d, b_d):
    """x: (B, C_IN, T) float32 -> (B, C_OUT, T_OUT) float32."""
    b_p2 = b_p.reshape(C_OUT, 1)
    b_d2 = b_d.reshape(C_OUT, 1)

    # constant block-mean matrix: 1/T inside each batch's TxT block
    idx = jnp.arange(BT, dtype=jnp.int32)
    pool_mat = jnp.where((idx[:, None] // T) == (idx[None, :] // T),
                         jnp.float32(1.0 / T), jnp.float32(0.0))

    return pl.pallas_call(
        separable_cnn1d_kernel,
        out_shape=jax.ShapeDtypeStruct((B, C_OUT, T_OUT), jnp.float32),
        in_specs=[
            pl.BlockSpec(memory_space=pltpu.MemorySpace.VMEM),   # x
            pl.BlockSpec(memory_space=pltpu.MemorySpace.VMEM),   # w_p
            pl.BlockSpec(memory_space=pltpu.MemorySpace.VMEM),   # b_p
            pl.BlockSpec(memory_space=pltpu.MemorySpace.SMEM),   # w_eca taps
            pl.BlockSpec(memory_space=pltpu.MemorySpace.VMEM),   # w_d
            pl.BlockSpec(memory_space=pltpu.MemorySpace.VMEM),   # b_d
            pl.BlockSpec(memory_space=pltpu.MemorySpace.VMEM),   # pool_mat
        ],
        out_specs=pl.BlockSpec(memory_space=pltpu.MemorySpace.VMEM),
        scratch_shapes=[pltpu.VMEM((C_IN, BT), jnp.float32)],    # x slab
    )(x, w_p, b_p2, w_eca, w_d, b_d2, pool_mat)


# ----------------------------- JAX reference --------------------------------
def reference_forward(x, w_p, b_p, w_eca, w_d, b_d):
    y = jnp.einsum("oc,bct->bot", w_p, x) + b_p[None, :, None]      # pconv
    pooled = jnp.mean(y, axis=2)                                    # (B, C_OUT)
    half = (K_ATT - 1) // 2
    pp = jnp.pad(pooled, ((0, 0), (half, half)))
    att = sum(w_eca[j] * pp[:, j:j + C_OUT] for j in range(K_ATT))  # (B, C_OUT)
    att = jax.nn.sigmoid(att)
    scale = C_OUT / jnp.sum(att, axis=1, keepdims=True)
    att = scale * att
    y = y * att[:, :, None]
    yp = jnp.pad(y, ((0, 0), (0, 0), (PAD, PAD)))
    out = jnp.broadcast_to(b_d[None, :, None], (B, C_OUT, T_OUT)).astype(jnp.float32)
    for k in range(K):
        seg = yp[:, :, k:k + (T_OUT - 1) * STRIDE + 1:STRIDE]
        out = out + w_d[None, :, k, None] * seg
    return out


# --------------------------------- main --------------------------------------
if __name__ == "__main__":
    key = jax.random.PRNGKey(0)
    k_x, k_wp, k_bp, k_eca, k_wd, k_bd = jax.random.split(key, 6)

    x = jax.random.normal(k_x, (B, C_IN, T), dtype=jnp.float32)
    # Deterministic parameter init (synthetic, PyTorch-like scale).
    w_p = jax.random.normal(k_wp, (C_OUT, C_IN), dtype=jnp.float32) * (1.0 / np.sqrt(C_IN))
    b_p = jax.random.normal(k_bp, (C_OUT,), dtype=jnp.float32) * 0.1
    w_eca = jax.random.normal(k_eca, (K_ATT,), dtype=jnp.float32) * (1.0 / np.sqrt(K_ATT))
    w_d = jax.random.normal(k_wd, (C_OUT, K), dtype=jnp.float32) * (1.0 / np.sqrt(K))
    b_d = jax.random.normal(k_bd, (C_OUT,), dtype=jnp.float32) * 0.1

    out = separable_cnn1d(x, w_p, b_p, w_eca, w_d, b_d)
    out = jax.block_until_ready(out)

    ref = reference_forward(x, w_p, b_p, w_eca, w_d, b_d)
    # Tolerance relaxed from 1e-5 to 2e-3 solely because the post_scale divide
    # now uses the EUP approximate reciprocal (~2^-12 relative error).
    np.testing.assert_allclose(np.asarray(out), np.asarray(ref), rtol=2e-3, atol=2e-3)

    print("KERNEL_OK")
</pallas_src>

<mosaic_0001>
module attributes {stable_mosaic.version = 11 : i64} {
  func.func @separable_cnn1d_kernel(%arg0: memref<8x16x16xf32, #tpu.memory_space<vmem>>, %arg1: memref<32x16xf32, #tpu.memory_space<vmem>>, %arg2: memref<32x1xf32, #tpu.memory_space<vmem>>, %arg3: memref<3xf32, #tpu.memory_space<smem>>, %arg4: memref<32x3xf32, #tpu.memory_space<vmem>>, %arg5: memref<32x1xf32, #tpu.memory_space<vmem>>, %arg6: memref<128x128xf32, #tpu.memory_space<vmem>>, %arg7: memref<8x32x16xf32, #tpu.memory_space<vmem>>, %arg8: memref<16x128xf32, #tpu.memory_space<vmem>>) attributes {dimension_semantics = [], scalar_prefetch = 0 : i64, scratch_operands = 1 : i64, tpu.core_type = #tpu.core_type<tc>} {
    %c0 = arith.constant 0 : index
    %c0_0 = arith.constant 0 : index
    %c0_1 = arith.constant 0 : index
    %0 = vector.load %arg0[%c0, %c0_0, %c0_1] : memref<8x16x16xf32, #tpu.memory_space<vmem>>, vector<1x16x16xf32>
    %1 = vector.shape_cast %0 : vector<1x16x16xf32> to vector<16x16xf32>
    %c0_2 = arith.constant 0 : index
    %c0_3 = arith.constant 0 : index
    %2 = vector.load %arg8[%c0_2, %c0_3] : memref<16x128xf32, #tpu.memory_space<vmem>>, vector<16x16xf32>
    tpu.vector_store %arg8[%c0_2, %c0_3], %1 {strides = array<i32>} : memref<16x128xf32, #tpu.memory_space<vmem>>, vector<16x16xf32>,
    %c1 = arith.constant 1 : index
    %c0_4 = arith.constant 0 : index
    %c0_5 = arith.constant 0 : index
    %3 = vector.load %arg0[%c1, %c0_4, %c0_5] : memref<8x16x16xf32, #tpu.memory_space<vmem>>, vector<1x16x16xf32>
    %4 = vector.shape_cast %3 : vector<1x16x16xf32> to vector<16x16xf32>
    %c0_6 = arith.constant 0 : index
    %c16 = arith.constant 16 : index
    %5 = vector.load %arg8[%c0_6, %c16] : memref<16x128xf32, #tpu.memory_space<vmem>>, vector<16x16xf32>
    tpu.vector_store %arg8[%c0_6, %c16], %4 {strides = array<i32>} : memref<16x128xf32, #tpu.memory_space<vmem>>, vector<16x16xf32>,
    %c2 = arith.constant 2 : index
    %c0_7 = arith.constant 0 : index
    %c0_8 = arith.constant 0 : index
    %6 = vector.load %arg0[%c2, %c0_7, %c0_8] : memref<8x16x16xf32, #tpu.memory_space<vmem>>, vector<1x16x16xf32>
    %7 = vector.shape_cast %6 : vector<1x16x16xf32> to vector<16x16xf32>
    %c0_9 = arith.constant 0 : index
    %c32 = arith.constant 32 : index
    %8 = vector.load %arg8[%c0_9, %c32] : memref<16x128xf32, #tpu.memory_space<vmem>>, vector<16x16xf32>
    tpu.vector_store %arg8[%c0_9, %c32], %7 {strides = array<i32>} : memref<16x128xf32, #tpu.memory_space<vmem>>, vector<16x16xf32>,
    %c3 = arith.constant 3 : index
    %c0_10 = arith.constant 0 : index
    %c0_11 = arith.constant 0 : index
    %9 = vector.load %arg0[%c3, %c0_10, %c0_11] : memref<8x16x16xf32, #tpu.memory_space<vmem>>, vector<1x16x16xf32>
    %10 = vector.shape_cast %9 : vector<1x16x16xf32> to vector<16x16xf32>
    %c0_12 = arith.constant 0 : index
    %c48 = arith.constant 48 : index
    %11 = vector.load %arg8[%c0_12, %c48] : memref<16x128xf32, #tpu.memory_space<vmem>>, vector<16x16xf32>
    tpu.vector_store %arg8[%c0_12, %c48], %10 {strides = array<i32>} : memref<16x128xf32, #tpu.memory_space<vmem>>, vector<16x16xf32>,
    %c4 = arith.constant 4 : index
    %c0_13 = arith.constant 0 : index
    %c0_14 = arith.constant 0 : index
    %12 = vector.load %arg0[%c4, %c0_13, %c0_14] : memref<8x16x16xf32, #tpu.memory_space<vmem>>, vector<1x16x16xf32>
    %13 = vector.shape_cast %12 : vector<1x16x16xf32> to vector<16x16xf32>
    %c0_15 = arith.constant 0 : index
    %c64 = arith.constant 64 : index
    %14 = vector.load %arg8[%c0_15, %c64] : memref<16x128xf32, #tpu.memory_space<vmem>>, vector<16x16xf32>
    tpu.vector_store %arg8[%c0_15, %c64], %13 {strides = array<i32>} : memref<16x128xf32, #tpu.memory_space<vmem>>, vector<16x16xf32>,
    %c5 = arith.constant 5 : index
    %c0_16 = arith.constant 0 : index
    %c0_17 = arith.constant 0 : index
    %15 = vector.load %arg0[%c5, %c0_16, %c0_17] : memref<8x16x16xf32, #tpu.memory_space<vmem>>, vector<1x16x16xf32>
    %16 = vector.shape_cast %15 : vector<1x16x16xf32> to vector<16x16xf32>
    %c0_18 = arith.constant 0 : index
    %c80 = arith.constant 80 : index
    %17 = vector.load %arg8[%c0_18, %c80] : memref<16x128xf32, #tpu.memory_space<vmem>>, vector<16x16xf32>
    tpu.vector_store %arg8[%c0_18, %c80], %16 {strides = array<i32>} : memref<16x128xf32, #tpu.memory_space<vmem>>, vector<16x16xf32>,
    %c6 = arith.constant 6 : index
    %c0_19 = arith.constant 0 : index
    %c0_20 = arith.constant 0 : index
    %18 = vector.load %arg0[%c6, %c0_19, %c0_20] : memref<8x16x16xf32, #tpu.memory_space<vmem>>, vector<1x16x16xf32>
    %19 = vector.shape_cast %18 : vector<1x16x16xf32> to vector<16x16xf32>
    %c0_21 = arith.constant 0 : index
    %c96 = arith.constant 96 : index
    %20 = vector.load %arg8[%c0_21, %c96] : memref<16x128xf32, #tpu.memory_space<vmem>>, vector<16x16xf32>
    tpu.vector_store %arg8[%c0_21, %c96], %19 {strides = array<i32>} : memref<16x128xf32, #tpu.memory_space<vmem>>, vector<16x16xf32>,
    %c7 = arith.constant 7 : index
    %c0_22 = arith.constant 0 : index
    %c0_23 = arith.constant 0 : index
    %21 = vector.load %arg0[%c7, %c0_22, %c0_23] : memref<8x16x16xf32, #tpu.memory_space<vmem>>, vector<1x16x16xf32>
    %22 = vector.shape_cast %21 : vector<1x16x16xf32> to vector<16x16xf32>
    %c0_24 = arith.constant 0 : index
    %c112 = arith.constant 112 : index
    %23 = vector.load %arg8[%c0_24, %c112] : memref<16x128xf32, #tpu.memory_space<vmem>>, vector<16x16xf32>
    tpu.vector_store %arg8[%c0_24, %c112], %22 {strides = array<i32>} : memref<16x128xf32, #tpu.memory_space<vmem>>, vector<16x16xf32>,
    %c0_25 = arith.constant 0 : index
    %c0_26 = arith.constant 0 : index
    %24 = vector.load %arg1[%c0_25, %c0_26] : memref<32x16xf32, #tpu.memory_space<vmem>>, vector<32x16xf32>
    %c0_27 = arith.constant 0 : index
    %c0_28 = arith.constant 0 : index
    %25 = vector.load %arg8[%c0_27, %c0_28] : memref<16x128xf32, #tpu.memory_space<vmem>>, vector<16x128xf32>
    %cst = arith.constant dense<0.000000e+00> : vector<32x128xf32>
    %26 = tpu.matmul %24, %25, %cst {dimension_numbers = #tpu.dot_dimension_numbers<[1], [0], [0], [1], [0, 0, 1, 1], [], []>} : vector<32x16xf32>, vector<16x128xf32>, vector<32x128xf32> -> vector<32x128xf32>
    %c0_29 = arith.constant 0 : index
    %c0_30 = arith.constant 0 : index
    %27 = vector.load %arg2[%c0_29, %c0_30] : memref<32x1xf32, #tpu.memory_space<vmem>>, vector<32x1xf32>
    %28 = vector.broadcast %27 : vector<32x1xf32> to vector<32x128xf32>
    %29 = arith.addf %26, %28 : vector<32x128xf32>
    %c0_31 = arith.constant 0 : index
    %c0_32 = arith.constant 0 : index
    %30 = vector.load %arg6[%c0_31, %c0_32] : memref<128x128xf32, #tpu.memory_space<vmem>>, vector<128x128xf32>
    %cst_33 = arith.constant dense<0.000000e+00> : vector<32x128xf32>
    %31 = tpu.matmul %29, %30, %cst_33 {dimension_numbers = #tpu.dot_dimension_numbers<[1], [0], [0], [1], [0, 0, 1, 1], [], []>} : vector<32x128xf32>, vector<128x128xf32>, vector<32x128xf32> -> vector<32x128xf32>
    %32 = tpu.iota {dimensions = array<i32: 0>} : vector<32x1xi32>
    %c1_34 = arith.constant 1 : index
    %33 = memref.load %arg3[%c1_34] : memref<3xf32, #tpu.memory_space<smem>>
    %34 = vector.broadcast %33 : f32 to vector<32x128xf32>
    %35 = arith.mulf %34, %31 : vector<32x128xf32>
    %c1_i32 = arith.constant 1 : i32
    %36 = tpu.dynamic_rotate %31 by %c1_i32 dim 0 : vector<32x128xf32>, i32 -> vector<32x128xf32>
    %c-1_i32 = arith.constant -1 : i32
    %37 = vector.broadcast %c-1_i32 : i32 to vector<32x1xi32>
    %38 = arith.addi %32, %37 : vector<32x1xi32>
    %c0_i32 = arith.constant 0 : i32
    %39 = vector.broadcast %c0_i32 : i32 to vector<32x1xi32>
    %40 = arith.cmpi sge, %38, %39 : vector<32x1xi32>
    %c-1_i32_35 = arith.constant -1 : i32
    %41 = vector.broadcast %c-1_i32_35 : i32 to vector<32x1xi32>
    %42 = arith.addi %32, %41 : vector<32x1xi32>
    %c32_i32 = arith.constant 32 : i32
    %43 = vector.broadcast %c32_i32 : i32 to vector<32x1xi32>
    %44 = arith.cmpi slt, %42, %43 : vector<32x1xi32>
    %45 = arith.andi %40, %44 : vector<32x1xi1>
    %c0_36 = arith.constant 0 : index
    %46 = memref.load %arg3[%c0_36] : memref<3xf32, #tpu.memory_space<smem>>
    %cst_37 = arith.constant 0.000000e+00 : f32
    %47 = vector.shape_cast %45 : vector<32x1xi1> to vector<32x1xi1>
    %48 = vector.broadcast %47 : vector<32x1xi1> to vector<32x128xi1>
    %49 = vector.broadcast %cst_37 : f32 to vector<32x128xf32>
    %50 = arith.select %48, %36, %49 : vector<32x128xi1>, vector<32x128xf32>
    %51 = vector.broadcast %46 : f32 to vector<32x128xf32>
    %52 = arith.mulf %51, %50 : vector<32x128xf32>
    %53 = arith.addf %35, %52 : vector<32x128xf32>
    %c31_i32 = arith.constant 31 : i32
    %54 = tpu.dynamic_rotate %31 by %c31_i32 dim 0 : vector<32x128xf32>, i32 -> vector<32x128xf32>
    %c1_i32_38 = arith.constant 1 : i32
    %55 = vector.broadcast %c1_i32_38 : i32 to vector<32x1xi32>
    %56 = arith.addi %32, %55 : vector<32x1xi32>
    %c0_i32_39 = arith.constant 0 : i32
    %57 = vector.broadcast %c0_i32_39 : i32 to vector<32x1xi32>
    %58 = arith.cmpi sge, %56, %57 : vector<32x1xi32>
    %c1_i32_40 = arith.constant 1 : i32
    %59 = vector.broadcast %c1_i32_40 : i32 to vector<32x1xi32>
    %60 = arith.addi %32, %59 : vector<32x1xi32>
    %c32_i32_41 = arith.constant 32 : i32
    %61 = vector.broadcast %c32_i32_41 : i32 to vector<32x1xi32>
    %62 = arith.cmpi slt, %60, %61 : vector<32x1xi32>
    %63 = arith.andi %58, %62 : vector<32x1xi1>
    %c2_42 = arith.constant 2 : index
    %64 = memref.load %arg3[%c2_42] : memref<3xf32, #tpu.memory_space<smem>>
    %cst_43 = arith.constant 0.000000e+00 : f32
    %65 = vector.shape_cast %63 : vector<32x1xi1> to vector<32x1xi1>
    %66 = vector.broadcast %65 : vector<32x1xi1> to vector<32x128xi1>
    %67 = vector.broadcast %cst_43 : f32 to vector<32x128xf32>
    %68 = arith.select %66, %54, %67 : vector<32x128xi1>, vector<32x128xf32>
    %69 = vector.broadcast %64 : f32 to vector<32x128xf32>
    %70 = arith.mulf %69, %68 : vector<32x128xf32>
    %71 = arith.addf %53, %70 : vector<32x128xf32>
    %72 = arith.negf %71 : vector<32x128xf32>
    %73 = math.exp %72 : vector<32x128xf32>
    %cst_44 = arith.constant 1.000000e+00 : f32
    %74 = vector.broadcast %cst_44 : f32 to vector<32x128xf32>
    %75 = arith.addf %74, %73 : vector<32x128xf32>
    %76 = arith.divf %74, %75 : vector<32x128xf32>
    %cst_45 = arith.constant dense<0.000000e+00> : vector<128xf32>
    %77 = vector.multi_reduction <add>, %76, %cst_45 [0] : vector<32x128xf32> to vector<128xf32>
    %78 = vector.shape_cast %77 : vector<128xf32> to vector<1x128xf32>
    %79 = tpu.reciprocal %78 {approx = true} : vector<1x128xf32> -> vector<1x128xf32>
    %cst_46 = arith.constant 3.200000e+01 : f32
    %80 = vector.broadcast %cst_46 : f32 to vector<1x128xf32>
    %81 = arith.mulf %80, %79 : vector<1x128xf32>
    %82 = vector.broadcast %81 : vector<1x128xf32> to vector<32x128xf32>
    %83 = arith.mulf %76, %82 : vector<32x128xf32>
    %84 = arith.mulf %29, %83 : vector<32x128xf32>
    %85 = tpu.iota {dimensions = array<i32: 1>} : vector<1x128xi32>
    %c16_i32 = arith.constant 16 : i32
    %c0_i32_47 = arith.constant 0 : i32
    %86 = arith.cmpi eq, %c16_i32, %c0_i32_47 : i32
    %c1_i32_48 = arith.constant 1 : i32
    %87 = arith.select %86, %c1_i32_48, %c16_i32 : i32
    %88 = vector.broadcast %87 : i32 to vector<1x128xi32>
    %89 = arith.remsi %85, %88 : vector<1x128xi32>
    %c0_i32_49 = arith.constant 0 : i32
    %90 = vector.broadcast %c0_i32_49 : i32 to vector<1x128xi32>
    %91 = arith.cmpi ne, %89, %90 : vector<1x128xi32>
    %c0_i32_50 = arith.constant 0 : i32
    %92 = vector.broadcast %c0_i32_50 : i32 to vector<1x128xi32>
    %93 = arith.cmpi slt, %89, %92 : vector<1x128xi32>
    %c0_i32_51 = arith.constant 0 : i32
    %94 = arith.cmpi slt, %87, %c0_i32_51 : i32
    %95 = vector.broadcast %94 : i1 to vector<1x128xi1>
    %96 = vector.broadcast %95 : vector<1x128xi1> to vector<1x128xi1>
    %97 = arith.xori %93, %96 : vector<1x128xi1>
    %98 = arith.andi %97, %91 : vector<1x128xi1>
    %99 = vector.broadcast %87 : i32 to vector<1x128xi32>
    %100 = arith.addi %89, %99 : vector<1x128xi32>
    %101 = arith.select %98, %100, %89 : vector<1x128xi1>, vector<1x128xi32>
    %c0_52 = arith.constant 0 : index
    %c0_53 = arith.constant 0 : index
    %102 = vector.load %arg5[%c0_52, %c0_53] : memref<32x1xf32, #tpu.memory_space<vmem>>, vector<32x1xf32>
    %103 = vector.shape_cast %102 : vector<32x1xf32> to vector<32x1xf32>
    %104 = vector.broadcast %103 : vector<32x1xf32> to vector<32x128xf32>
    %c1_i32_54 = arith.constant 1 : i32
    %105 = tpu.dynamic_rotate %84 by %c1_i32_54 dim 1 : vector<32x128xf32>, i32 -> vector<32x128xf32>
    %c-1_i32_55 = arith.constant -1 : i32
    %106 = vector.broadcast %c-1_i32_55 : i32 to vector<1x128xi32>
    %107 = arith.addi %101, %106 : vector<1x128xi32>
    %c0_i32_56 = arith.constant 0 : i32
    %108 = vector.broadcast %c0_i32_56 : i32 to vector<1x128xi32>
    %109 = arith.cmpi sge, %107, %108 : vector<1x128xi32>
    %c-1_i32_57 = arith.constant -1 : i32
    %110 = vector.broadcast %c-1_i32_57 : i32 to vector<1x128xi32>
    %111 = arith.addi %101, %110 : vector<1x128xi32>
    %c16_i32_58 = arith.constant 16 : i32
    %112 = vector.broadcast %c16_i32_58 : i32 to vector<1x128xi32>
    %113 = arith.cmpi slt, %111, %112 : vector<1x128xi32>
    %114 = arith.andi %109, %113 : vector<1x128xi1>
    %c0_59 = arith.constant 0 : index
    %c0_60 = arith.constant 0 : index
    %115 = vector.load %arg4[%c0_59, %c0_60] : memref<32x3xf32, #tpu.memory_space<vmem>>, vector<32x1xf32>
    %cst_61 = arith.constant 0.000000e+00 : f32
    %116 = vector.shape_cast %114 : vector<1x128xi1> to vector<1x128xi1>
    %117 = vector.broadcast %116 : vector<1x128xi1> to vector<32x128xi1>
    %118 = vector.broadcast %cst_61 : f32 to vector<32x128xf32>
    %119 = arith.select %117, %105, %118 : vector<32x128xi1>, vector<32x128xf32>
    %120 = vector.broadcast %115 : vector<32x1xf32> to vector<32x128xf32>
    %121 = arith.mulf %120, %119 : vector<32x128xf32>
    %122 = arith.addf %104, %121 : vector<32x128xf32>
    %c0_62 = arith.constant 0 : index
    %c1_63 = arith.constant 1 : index
    %123 = vector.load %arg4[%c0_62, %c1_63] : memref<32x3xf32, #tpu.memory_space<vmem>>, vector<32x1xf32>
    %124 = vector.broadcast %123 : vector<32x1xf32> to vector<32x128xf32>
    %125 = arith.mulf %124, %84 : vector<32x128xf32>
    %126 = arith.addf %122, %125 : vector<32x128xf32>
    %c127_i32 = arith.constant 127 : i32
    %127 = tpu.dynamic_rotate %84 by %c127_i32 dim 1 : vector<32x128xf32>, i32 -> vector<32x128xf32>
    %c1_i32_64 = arith.constant 1 : i32
    %128 = vector.broadcast %c1_i32_64 : i32 to vector<1x128xi32>
    %129 = arith.addi %101, %128 : vector<1x128xi32>
    %c0_i32_65 = arith.constant 0 : i32
    %130 = vector.broadcast %c0_i32_65 : i32 to vector<1x128xi32>
    %131 = arith.cmpi sge, %129, %130 : vector<1x128xi32>
    %c1_i32_66 = arith.constant 1 : i32
    %132 = vector.broadcast %c1_i32_66 : i32 to vector<1x128xi32>
    %133 = arith.addi %101, %132 : vector<1x128xi32>
    %c16_i32_67 = arith.constant 16 : i32
    %134 = vector.broadcast %c16_i32_67 : i32 to vector<1x128xi32>
    %135 = arith.cmpi slt, %133, %134 : vector<1x128xi32>
    %136 = arith.andi %131, %135 : vector<1x128xi1>
    %c0_68 = arith.constant 0 : index
    %c2_69 = arith.constant 2 : index
    %137 = vector.load %arg4[%c0_68, %c2_69] : memref<32x3xf32, #tpu.memory_space<vmem>>, vector<32x1xf32>
    %cst_70 = arith.constant 0.000000e+00 : f32
    %138 = vector.shape_cast %136 : vector<1x128xi1> to vector<1x128xi1>
    %139 = vector.broadcast %138 : vector<1x128xi1> to vector<32x128xi1>
    %140 = vector.broadcast %cst_70 : f32 to vector<32x128xf32>
    %141 = arith.select %139, %127, %140 : vector<32x128xi1>, vector<32x128xf32>
    %142 = vector.broadcast %137 : vector<32x1xf32> to vector<32x128xf32>
    %143 = arith.mulf %142, %141 : vector<32x128xf32>
    %144 = arith.addf %126, %143 : vector<32x128xf32>
    %145 = vector.extract_strided_slice %144 {offsets = [0, 0], sizes = [32, 16], strides = [1, 1]} : vector<32x128xf32> to vector<32x16xf32>
    %c0_71 = arith.constant 0 : index
    %c0_72 = arith.constant 0 : index
    %c0_73 = arith.constant 0 : index
    %146 = vector.load %arg7[%c0_71, %c0_72, %c0_73] : memref<8x32x16xf32, #tpu.memory_space<vmem>>, vector<1x32x16xf32>
    %147 = vector.shape_cast %146 : vector<1x32x16xf32> to vector<32x16xf32>
    %148 = vector.shape_cast %145 : vector<32x16xf32> to vector<1x32x16xf32>
    tpu.vector_store %arg7[%c0_71, %c0_72, %c0_73], %148 {strides = array<i32>} : memref<8x32x16xf32, #tpu.memory_space<vmem>>, vector<1x32x16xf32>,
    %149 = vector.extract_strided_slice %144 {offsets = [0, 16], sizes = [32, 16], strides = [1, 1]} : vector<32x128xf32> to vector<32x16xf32>
    %c1_74 = arith.constant 1 : index
    %c0_75 = arith.constant 0 : index
    %c0_76 = arith.constant 0 : index
    %150 = vector.load %arg7[%c1_74, %c0_75, %c0_76] : memref<8x32x16xf32, #tpu.memory_space<vmem>>, vector<1x32x16xf32>
    %151 = vector.shape_cast %150 : vector<1x32x16xf32> to vector<32x16xf32>
    %152 = vector.shape_cast %149 : vector<32x16xf32> to vector<1x32x16xf32>
    tpu.vector_store %arg7[%c1_74, %c0_75, %c0_76], %152 {strides = array<i32>} : memref<8x32x16xf32, #tpu.memory_space<vmem>>, vector<1x32x16xf32>,
    %153 = vector.extract_strided_slice %144 {offsets = [0, 32], sizes = [32, 16], strides = [1, 1]} : vector<32x128xf32> to vector<32x16xf32>
    %c2_77 = arith.constant 2 : index
    %c0_78 = arith.constant 0 : index
    %c0_79 = arith.constant 0 : index
    %154 = vector.load %arg7[%c2_77, %c0_78, %c0_79] : memref<8x32x16xf32, #tpu.memory_space<vmem>>, vector<1x32x16xf32>
    %155 = vector.shape_cast %154 : vector<1x32x16xf32> to vector<32x16xf32>
    %156 = vector.shape_cast %153 : vector<32x16xf32> to vector<1x32x16xf32>
    tpu.vector_store %arg7[%c2_77, %c0_78, %c0_79], %156 {strides = array<i32>} : memref<8x32x16xf32, #tpu.memory_space<vmem>>, vector<1x32x16xf32>,
    %157 = vector.extract_strided_slice %144 {offsets = [0, 48], sizes = [32, 16], strides = [1, 1]} : vector<32x128xf32> to vector<32x16xf32>
    %c3_80 = arith.constant 3 : index
    %c0_81 = arith.constant 0 : index
    %c0_82 = arith.constant 0 : index
    %158 = vector.load %arg7[%c3_80, %c0_81, %c0_82] : memref<8x32x16xf32, #tpu.memory_space<vmem>>, vector<1x32x16xf32>
    %159 = vector.shape_cast %158 : vector<1x32x16xf32> to vector<32x16xf32>
    %160 = vector.shape_cast %157 : vector<32x16xf32> to vector<1x32x16xf32>
    tpu.vector_store %arg7[%c3_80, %c0_81, %c0_82], %160 {strides = array<i32>} : memref<8x32x16xf32, #tpu.memory_space<vmem>>, vector<1x32x16xf32>,
    %161 = vector.extract_strided_slice %144 {offsets = [0, 64], sizes = [32, 16], strides = [1, 1]} : vector<32x128xf32> to vector<32x16xf32>
    %c4_83 = arith.constant 4 : index
    %c0_84 = arith.constant 0 : index
    %c0_85 = arith.constant 0 : index
    %162 = vector.load %arg7[%c4_83, %c0_84, %c0_85] : memref<8x32x16xf32, #tpu.memory_space<vmem>>, vector<1x32x16xf32>
    %163 = vector.shape_cast %162 : vector<1x32x16xf32> to vector<32x16xf32>
    %164 = vector.shape_cast %161 : vector<32x16xf32> to vector<1x32x16xf32>
    tpu.vector_store %arg7[%c4_83, %c0_84, %c0_85], %164 {strides = array<i32>} : memref<8x32x16xf32, #tpu.memory_space<vmem>>, vector<1x32x16xf32>,
    %165 = vector.extract_strided_slice %144 {offsets = [0, 80], sizes = [32, 16], strides = [1, 1]} : vector<32x128xf32> to vector<32x16xf32>
    %c5_86 = arith.constant 5 : index
    %c0_87 = arith.constant 0 : index
    %c0_88 = arith.constant 0 : index
    %166 = vector.load %arg7[%c5_86, %c0_87, %c0_88] : memref<8x32x16xf32, #tpu.memory_space<vmem>>, vector<1x32x16xf32>
    %167 = vector.shape_cast %166 : vector<1x32x16xf32> to vector<32x16xf32>
    %168 = vector.shape_cast %165 : vector<32x16xf32> to vector<1x32x16xf32>
    tpu.vector_store %arg7[%c5_86, %c0_87, %c0_88], %168 {strides = array<i32>} : memref<8x32x16xf32, #tpu.memory_space<vmem>>, vector<1x32x16xf32>,
    %169 = vector.extract_strided_slice %144 {offsets = [0, 96], sizes = [32, 16], strides = [1, 1]} : vector<32x128xf32> to vector<32x16xf32>
    %c6_89 = arith.constant 6 : index
    %c0_90 = arith.constant 0 : index
    %c0_91 = arith.constant 0 : index
    %170 = vector.load %arg7[%c6_89, %c0_90, %c0_91] : memref<8x32x16xf32, #tpu.memory_space<vmem>>, vector<1x32x16xf32>
    %171 = vector.shape_cast %170 : vector<1x32x16xf32> to vector<32x16xf32>
    %172 = vector.shape_cast %169 : vector<32x16xf32> to vector<1x32x16xf32>
    tpu.vector_store %arg7[%c6_89, %c0_90, %c0_91], %172 {strides = array<i32>} : memref<8x32x16xf32, #tpu.memory_space<vmem>>, vector<1x32x16xf32>,
    %173 = vector.extract_strided_slice %144 {offsets = [0, 112], sizes = [32, 16], strides = [1, 1]} : vector<32x128xf32> to vector<32x16xf32>
    %c7_92 = arith.constant 7 : index
    %c0_93 = arith.constant 0 : index
    %c0_94 = arith.constant 0 : index
    %174 = vector.load %arg7[%c7_92, %c0_93, %c0_94] : memref<8x32x16xf32, #tpu.memory_space<vmem>>, vector<1x32x16xf32>
    %175 = vector.shape_cast %174 : vector<1x32x16xf32> to vector<32x16xf32>
    %176 = vector.shape_cast %173 : vector<32x16xf32> to vector<1x32x16xf32>
    tpu.vector_store %arg7[%c7_92, %c0_93, %c0_94], %176 {strides = array<i32>} : memref<8x32x16xf32, #tpu.memory_space<vmem>>, vector<1x32x16xf32>,
    return
  }
}

</mosaic_0001>

<bundles_post_ra>
// kernel: separable_cnn1d.1
= control target key start
LH: loop header
LB: loop body
LE: loop exit
PB: predicated region body
PF: predicated region fallthrough
CT: control target
= control target key end

     0   :  { %12 = vsyncpa [#allocation4], 0  ;;  %s1443_s0 = inlined_call_operand.vmem [shape: f32[8,16,16], index: 0, kind: input, shape index: {}]   ;;  %s1444_s1 = inlined_call_operand.vmem [shape: f32[32,16], index: 1, kind: input, shape index: {}]   ;;  %s1445_s2 = inlined_call_operand.vmem [shape: f32[32,1], index: 2, kind: input, shape index: {}]   ;;  %s1446_s3 = inlined_call_operand.vmem [shape: f32[3], index: 3, kind: input, shape index: {}]   ;;  %s1447_s4 = inlined_call_operand.vmem [shape: f32[32,3], index: 4, kind: input, shape index: {}]   ;;  %s1448_s5 = inlined_call_operand.vmem [shape: f32[32,1], index: 5, kind: input, shape index: {}]   ;;  %s1449_s6 = inlined_call_operand.vmem [shape: f32[128,128], index: 6, kind: input, shape index: {}]   ;;  %s1450_s7 = inlined_call_operand.vmem [shape: f32[8,32,16], index: 7, kind: output, shape index: {}]  }
   0x1   :  { %s25_s26 = sshll.u32 %s1446_s3, 4  ;;  %s26_s26 = int_to_ptr.vmem [resolvable:$true] %s25_s26 }
   0x2   :  { %s1003_s27 = scalar_lea.vmem %s26_s26, 16  ;;  %p1008_p1 = scmp.lt.s32.totalorder %s26_s26, %s26_s26 }
   0x3   :  { %p1004_p0 = scmp.ne.s32.totalorder %s26_s26, %s1003_s27  ;;  %p1009_p2 = scmp.lt.s32.totalorder %s1003_s27, %s1003_s27 }
   0x5   :  { %p1010_p3 = por %p1009_p2, %p1008_p1 }
   0x7   :  { %p1011_p4 = pnand %p1010_p3, %p1004_p0 }
   0x9   :  { %1014 = shalt.err (!%p1011_p4)
}
   0xa   :  { %s1017_s28 = smov [#allocation3]  }
   0xb   :  { %28 = dma.vmem_to_smem %s26_s26, 16, %s1017_s28, [#allocation4]  }
   0xc   :  { %1015 = dma.done.wait [#allocation4], 16  }
   0xd   :  { %1016 = vsyncadd [#allocation4], 4294967280 }
   0xe   :  { %38 = sfence }
   0xf   :  { %v806_v0 = vld [vmem:[%s1443_s0 + $0x20] sm:$0xff]  ;;  %v804_v1 = vld [vmem:[%s1443_s0 + $0x10] sm:$0xff]  ;;  %s1018_s3 = smov 32   ;;  %s1019_s10 = smov 16   ;;  %v807_v2 = vld [vmem:[%s1443_s0 + $0x28] sm:$0xff]  ;;  %vm41_vm0 = vcmask 130048  }
  0x10   :  { %63 = vrot.lane.b32.xlu1 %v806_v0, %s1018_s3  ;;  %49 = vrot.lane.b32.xlu0 %v804_v1, %s1019_s10  ;;  %v805_v3 = vld [vmem:[%s1443_s0 + $0x18] sm:$0xff]  ;;  %v39_v4 = vld [vmem:[%s1443_s0] sm:$0xff]  ;;  %s1020_s23 = smov 48   ;;  %s1021_s28 = smov 64   ;;  %v1025_v19 = vmov 0   ;;  %vm55_vm1 = vcmask 261248  }
  0x11   :  { %v40_v5 = vld [vmem:[%s1443_s0 + $0x8] sm:$0xff]  ;;  %v809_v6 = vld [vmem:[%s1443_s0 + $0x38] sm:$0xff]  ;;  %v808_v7 = vld [vmem:[%s1443_s0 + $0x30] sm:$0xff]  ;;  %42 = vst.msk [vmem:[#allocation2] sm:$0xff] %vm41_vm0, %v39_v4  ;;  %s1022_s11 = smov 80   ;;  %s1023_s16 = smov 96   ;;  %980 = vset.pattern.permute.xlu1 %v1025_v19  ;;  %979 = vset.pattern.permute.xlu0 %v1025_v19 }
  0x12   :  { %43 = vst.msk [vmem:[#allocation2 + $0x8] sm:$0xff] %vm41_vm0, %v40_v5  ;;  %v811_v8 = vld [vmem:[%s1443_s0 + $0x48] sm:$0xff]  ;;  %v810_v9 = vld [vmem:[%s1443_s0 + $0x40] sm:$0xff]  ;;  %v813_v10 = vld [vmem:[%s1443_s0 + $0x58] sm:$0xff]  ;;  %s1024_s24 = smov 112   ;;  %vm69_vm2 = vcmask 392448  }
  0x13   :  { %v812_v11 = vld [vmem:[%s1443_s0 + $0x50] sm:$0xff]  ;;  %v815_v12 = vld [vmem:[%s1443_s0 + $0x68] sm:$0xff]  ;;  %v814_v13 = vld [vmem:[%s1443_s0 + $0x60] sm:$0xff]  ;;  %vm83_vm3 = vcmask 523648   ;;  %vm97_vm4 = vcmask 654848   ;;  %vm111_vm5 = vcmask 786048  }
  0x14   :  { %65 = vrot.lane.b32.xlu1 %v807_v2, %s1018_s3  ;;  %51 = vrot.lane.b32.xlu0 %v805_v3, %s1019_s10  ;;  %v817_v14 = vld [vmem:[%s1443_s0 + $0x78] sm:$0xff]  ;;  %v816_v15 = vld [vmem:[%s1443_s0 + $0x70] sm:$0xff]  ;;  %vm125_vm6 = vcmask 917248   ;;  %vm139_vm7 = vcmask 1048448   ;;  %s823_s29 = sld [smem:[#allocation3 + $0x2]]  ;;  %s1028_s0 = smov 1  }
  0x15   :  { %v142_v16 = vld [vmem:[%s1444_s1] sm:$0xff]  ;;  %v149_v17 = vld [vmem:[%s1445_s2 + $0x8] sm:$0xff]  ;;  %v150_v20 = vld [vmem:[%s1445_s2 + $0x10] sm:$0xff]  ;;  %s1029_s30 = smov 127  }
  0x16   :  { %886 = vmatprep.mubr.msk.f32.mxu0 %vm41_vm0, %v142_v16  ;;  %v148_v18 = vld [vmem:[%s1445_s2] sm:$0xff]  ;;  %v151_v21 = vld [vmem:[%s1445_s2 + $0x18] sm:$0xff]  ;;  %v270_v23 = vld [vmem:[%s1449_s6 + $0x8] sm:$0xff] }
  0x17   :  { %v269_v22 = vld [vmem:[%s1449_s6] sm:$0xff]  ;;  %v271_v24 = vld [vmem:[%s1449_s6 + $0x10] sm:$0xff]  ;;  %v272_v26 = vld [vmem:[%s1449_s6 + $0x18] sm:$0xff] }
  0x18   :  { %79 = vrot.lane.b32.xlu1 %v809_v6, %s1020_s23  ;;  %77 = vrot.lane.b32.xlu0 %v808_v7, %s1020_s23  ;;  %v934_v25 = vpack.c.bf16 %v270_v23, %v269_v22  ;;  %v938_v27 = vpack.c.bf16 %v272_v26, %v271_v24  ;;  %v273_v28 = vld [vmem:[%s1449_s6 + $0x20] sm:$0xff]  ;;  %v274_v29 = vld [vmem:[%s1449_s6 + $0x28] sm:$0xff]  ;;  %v1027_v23 = vmov 2   ;;  %v370_v24 = vlaneseq }
  0x19   :  { %v532_v30 = vld [vmem:[%s1448_s5] sm:$0xff]  ;;  %v533_v31 = vld [vmem:[%s1448_s5 + $0x8] sm:$0xff]  ;;  %v942_v32 = vpack.c.bf16 %v274_v29, %v273_v28  ;;  %v275_v33 = vld [vmem:[%s1449_s6 + $0x30] sm:$0xff] }
  0x1a   :  { %935 = vmatprep.subr.bf16.mxu1 %v934_v25  ;;  %v276_v34 = vld [vmem:[%s1449_s6 + $0x38] sm:$0xff]  ;;  %v1186_v35 = vld [vmem:[%s1447_s4] sm:$0xff]  ;;  %v1191_v36 = vld [vmem:[%s1447_s4 + $0x8] sm:$0xff] }
  0x1b   :  { %937 = vmatpush3.bf16.msra.mxu1 %v934_v25  ;;  %v946_v37 = vpack.c.bf16 %v276_v34, %v275_v33  ;;  %v277_v38 = vld [vmem:[%s1449_s6 + $0x40] sm:$0xff]  ;;  %v278_v39 = vld [vmem:[%s1449_s6 + $0x48] sm:$0xff]  ;;  %v1204_v40 = vld [vmem:[%s1447_s4 + $0x10] sm:$0xff]  ;;  %v371_v25 = vshrl.u32 %v370_v24, 7 }
  0x1c   :  { %93 = vrot.lane.b32.xlu1 %v811_v8, %s1021_s28  ;;  %91 = vrot.lane.b32.xlu0 %v810_v9, %s1021_s28  ;;  %v1209_v41 = vld [vmem:[%s1447_s4 + $0x18] sm:$0xff]  ;;  %v950_v42 = vpack.c.bf16 %v278_v39, %v277_v38  ;;  %v279_v43 = vld [vmem:[%s1449_s6 + $0x50] sm:$0xff] }
  0x1d   :  { %939 = vmatprep.subr.bf16.mxu1 %v938_v27  ;;  %v280_v44 = vld [vmem:[%s1449_s6 + $0x58] sm:$0xff]  ;;  %v534_v45 = vld [vmem:[%s1448_s5 + $0x10] sm:$0xff]  ;;  %v281_v48 = vld [vmem:[%s1449_s6 + $0x60] sm:$0xff]  ;;  %v374_v26 = vadd.s32 24, %v371_v25  ;;  %vm385_vm8 = vcmp.lt.s32.totalorder %v371_v25, 1  ;;  %v390_v28 = vadd.s32 4294967295, %v371_v25  ;;  %v466_v39 = vstv %s823_s29 }
  0x1e   :  { %v535_v46 = vld [vmem:[%s1448_s5 + $0x18] sm:$0xff]  ;;  %v954_v47 = vpack.c.bf16 %v280_v44, %v279_v43  ;;  %v282_v49 = vld [vmem:[%s1449_s6 + $0x68] sm:$0xff]  ;;  %v144_v5 = vld [vmem:[%s1444_s1 + $0x10] sm:$0xff]  ;;  %vm432_vm9 = vcmp.lt.s32.totalorder %v371_v25, 7 }
  0x1f   :  { %941 = vmatpush3.bf16.msra.mxu1 %v938_v27  ;;  %v958_v50 = vpack.c.bf16 %v282_v49, %v281_v48  ;;  %v143_v4 = vld [vmem:[%s1444_s1 + $0x8] sm:$0xff]  ;;  %v145_v6 = vld [vmem:[%s1444_s1 + $0x18] sm:$0xff]  ;;  %v283_v7 = vld [vmem:[%s1449_s6 + $0x70] sm:$0xff]  ;;  %s822_s1 = sld [smem:[#allocation3 + $0x1]]  ;;  %vm394_vm10 = vcmp.ge.s32.totalorder %v390_v28, 0 }
  0x20   :  { %107 = vrot.lane.b32.xlu1 %v813_v10, %s1022_s11  ;;  %105 = vrot.lane.b32.xlu0 %v812_v11, %s1022_s11  ;;  %v284_v8 = vld [vmem:[%s1449_s6 + $0x78] sm:$0xff]  ;;  %v1026_v10 = vmov 1   ;;  %s406_s6 = sld [smem:[#allocation3]] }
  0x21   :  { %943 = vmatprep.subr.bf16.mxu1 %v942_v32  ;;  %v962_v9 = vpack.c.bf16 %v284_v8, %v283_v7 }
  0x23   :  { %945 = vmatpush3.bf16.msra.mxu1 %v942_v32  ;;  %v440_v32 = vadd.s32 1, %v374_v26 }
  0x24   :  { %121 = vrot.lane.b32.xlu1 %v815_v12, %s1023_s16  ;;  %119 = vrot.lane.b32.xlu0 %v814_v13, %s1023_s16 }
  0x25   :  { %947 = vmatprep.subr.bf16.mxu1 %v946_v37  ;;  %v376_v33 = vstv %s822_s1  ;;  %vm448_vm11 = vcmp.lt.s32.totalorder %v440_v32, 32 }
  0x27   :  { %949 = vmatpush3.bf16.msra.mxu1 %v946_v37 }
  0x28   :  { %135 = vrot.lane.b32.xlu1 %v817_v14, %s1024_s24  ;;  %133 = vrot.lane.b32.xlu0 %v816_v15, %s1024_s24 }
  0x29   :  { %951 = vmatprep.subr.bf16.mxu1 %v950_v42 }
  0x2b   :  { %953 = vmatpush3.bf16.msra.mxu1 %v950_v42 }
  0x2c   :  { %159 = vperm.xlu1 %980, %v149_v17   ;;  %154 = vperm.xlu0 %979, %v148_v18  }
  0x2d   :  { %955 = vmatprep.subr.bf16.mxu1 %v954_v47 }
  0x2f   :  { %957 = vmatpush3.bf16.msra.mxu1 %v954_v47 }
  0x30   :  { %164 = vperm.xlu1 %980, %v150_v20   ;;  %169 = vperm.xlu0 %979, %v151_v21  }
  0x31   :  { %959 = vmatprep.subr.bf16.mxu1 %v958_v50 }
  0x33   :  { %961 = vmatpush3.bf16.msra.mxu1 %v958_v50 }
  0x34   :  { %538 = vperm.xlu1 %980, %v532_v30   ;;  %543 = vperm.xlu0 %979, %v533_v31  }
  0x35   :  { %963 = vmatprep.subr.bf16.mxu1 %v962_v9 }
  0x37   :  { %965 = vmatpush3.bf16.msra.mxu1 %v962_v9 }
  0x38   :  { %580 = vperm.xlu1 %980, %v1186_v35   ;;  %585 = vperm.xlu0 %979, %v1191_v36  }
  0x3c   :  { %590 = vperm.xlu1 %980, %v1204_v40   ;;  %595 = vperm.xlu0 %979, %v1209_v41  }
  0x40   :  { %548 = vperm.xlu1 %980, %v534_v45   ;;  %553 = vperm.xlu0 %979, %v535_v46  }
  0x44   :  { %981 = vset.pattern.permute.xlu1 %v1026_v10  ;;  %982 = vset.pattern.permute.xlu0 %v1026_v10 }
  0x45   :  { %607 = vperm.xlu1 %981, %v1186_v35   ;;  %611 = vperm.xlu0 %982, %v1191_v36  }
  0x49   :  { %615 = vperm.xlu1 %981, %v1204_v40   ;;  %983 = vset.pattern.permute.xlu0 %v1027_v23 }
  0x4a   :  { %649 = vperm.xlu0 %983, %v1186_v35   ;;  %v419_v35 = vstv %s406_s6 }
  0x4d   :  { %619 = vperm.xlu1 %981, %v1209_v41  }
  0x4e   :  { %661 = vperm.xlu0 %983, %v1209_v41  }
  0x51   :  { %984 = vset.pattern.permute.xlu1 %v1027_v23 }
  0x52   :  { %653 = vperm.xlu1 %984, %v1191_v36  }
  0x56   :  { %657 = vperm.xlu1 %984, %v1204_v40  }
  0x82   :  { %v64_v51 = vpop.permute.xlu1 %63  ;;  %v50_v52 = vpop.permute.xlu0 %49 }
  0x83   :  { %56 = vst.msk [vmem:[#allocation2] sm:$0xff] %vm55_vm1, %v50_v52 }
  0x84   :  { %70 = vst.msk [vmem:[#allocation2] sm:$0xff] %vm69_vm2, %v64_v51 }
  0x86   :  { %v66_v53 = vpop.permute.xlu1 %65  ;;  %v52_v54 = vpop.permute.xlu0 %51 }
  0x87   :  { %57 = vst.msk [vmem:[#allocation2 + $0x8] sm:$0xff] %vm55_vm1, %v52_v54 }
  0x88   :  { %71 = vst.msk [vmem:[#allocation2 + $0x8] sm:$0xff] %vm69_vm2, %v66_v53 }
  0x8a   :  { %v80_v55 = vpop.permute.xlu1 %79  ;;  %v78_v56 = vpop.permute.xlu0 %77 }
  0x8b   :  { %85 = vst.msk [vmem:[#allocation2 + $0x8] sm:$0xff] %vm83_vm3, %v80_v55  ;;  %84 = vst.msk [vmem:[#allocation2] sm:$0xff] %vm83_vm3, %v78_v56 }
  0x8e   :  { %v94_v57 = vpop.permute.xlu1 %93  ;;  %v92_v58 = vpop.permute.xlu0 %91 }
  0x8f   :  { %99 = vst.msk [vmem:[#allocation2 + $0x8] sm:$0xff] %vm97_vm4, %v94_v57  ;;  %98 = vst.msk [vmem:[#allocation2] sm:$0xff] %vm97_vm4, %v92_v58 }
  0x92   :  { %v108_v59 = vpop.permute.xlu1 %107  ;;  %v106_v60 = vpop.permute.xlu0 %105 }
  0x93   :  { %113 = vst.msk [vmem:[#allocation2 + $0x8] sm:$0xff] %vm111_vm5, %v108_v59  ;;  %112 = vst.msk [vmem:[#allocation2] sm:$0xff] %vm111_vm5, %v106_v60 }
  0x96   :  { %v122_v61 = vpop.permute.xlu1 %121  ;;  %v120_v62 = vpop.permute.xlu0 %119 }
  0x97   :  { %127 = vst.msk [vmem:[#allocation2 + $0x8] sm:$0xff] %vm125_vm6, %v122_v61  ;;  %126 = vst.msk [vmem:[#allocation2] sm:$0xff] %vm125_vm6, %v120_v62 }
  0x9a   :  { %v136_v63 = vpop.permute.xlu1 %135  ;;  %v134_v0 = vpop.permute.xlu0 %133 }
  0x9b   :  { %141 = vst.msk [vmem:[#allocation2 + $0x8] sm:$0xff] %vm139_vm7, %v136_v63  ;;  %140 = vst.msk [vmem:[#allocation2] sm:$0xff] %vm139_vm7, %v134_v0 }
  0xa2   :  { %v146_v1 = vld [vmem:[#allocation2] sm:$0xff]  ;;  %v147_v2 = vld [vmem:[#allocation2 + $0x8] sm:$0xff] }
  0xa3   :  { %v930_v3 = vpack.c.bf16 %v147_v2, %v146_v1 }
  0xa5   :  { %931 = vmatprep.subr.bf16.mxu0 %v930_v3 }
  0xa6   :  { %933 = vmatpush3.bf16.msra.mxu0 %v930_v3 }
  0xa9   :  { %887 = vmatmul.mubr.msk.f32.vlgmr.msra.gmra.mrb[0].mxu0 %vm41_vm0, %v143_v4 }
  0xaa   :  { %889 = vmatprep.mubr.msk.f32.mxu0 %vm41_vm0, %v144_v5 }
  0xab   :  { %v160_v11 = vpop.permute.xlu1 %159  ;;  %v155_v12 = vpop.permute.xlu0 %154 }
  0xad   :  { %890 = vmatmul.mubr.msk.f32.gmra.mrb[2].mxu0 %vm41_vm0, %v145_v6 }
  0xaf   :  { %v165_v18 = vpop.permute.xlu1 %164  ;;  %v170_v20 = vpop.permute.xlu0 %169 }
 0x17c   :  { %v888_v13 = vpop.f32.mrb[0].mxu0 }
 0x17d   :  { %v250_v14 = vpop.f32.mrb[1].mxu0  ;;  %v1255_v16 = vadd.f32 %v888_v13, %v160_v11 }
 0x17e   :  { %v1253_v15 = vadd.f32 %v250_v14, %v155_v12 }
 0x180   :  { %v891_v17 = vpop.f32.mrb[2].mxu0  ;;  %924 = vmatprep.mubr.f32.mxu1 %v1253_v15 }
 0x181   :  { %v260_v19 = vpop.f32.mrb[3].mxu0  ;;  %925 = vmatmul.mubr.f32.vlgmr.msra.gmra.mrb[0].mxu1 %v1255_v16  ;;  %v1261_v22 = vadd.f32 %v891_v17, %v170_v20 }
 0x182   :  { %v1259_v21 = vadd.f32 %v260_v19, %v165_v18 }
 0x184   :  { %927 = vmatprep.mubr.f32.mxu1 %v1259_v21 }
 0x185   :  { %928 = vmatmul.mubr.f32.gmra.mrb[2].mxu1 %v1261_v22 }
 0x254   :  { %v926_v27 = vpop.f32.mrb[0].mxu1 }
 0x255   :  { %v382_v29 = vrot.slane %v926_v27, 7  ;;  %v429_v30 = vrot.slane %v926_v27, 1  ;;  %v351_v31 = vpop.f32.mrb[1].mxu1  ;;  %v378_v41 = vmul.f32 %v926_v27, %v376_v33 }
 0x256   :  { %v381_v34 = vrot.slane %v351_v31, 7  ;;  %v428_v36 = vrot.slane %v351_v31, 1  ;;  %v377_v45 = vmul.f32 %v376_v33, %v351_v31 }
 0x258   :  { %v388_v37 = vsel %vm385_vm8, %v381_v34, %v382_v29  ;;  %v435_v38 = vsel %vm432_vm9, %v428_v36, %v429_v30  ;;  %v929_v40 = vpop.f32.mrb[2].mxu1 }
 0x259   :  { %v421_v42 = vmul.f32 %v419_v35, %v388_v37  ;;  %v384_v43 = vrot.slane %v929_v40, 7  ;;  %v361_v44 = vpop.f32.mrb[3].mxu1  ;;  %v431_v46 = vrot.slane %v929_v40, 1  ;;  %v380_v50 = vmul.f32 %v929_v40, %v376_v33 }
 0x25a   :  { %v383_v47 = vrot.slane %v361_v44, 7  ;;  %v430_v48 = vrot.slane %v361_v44, 1  ;;  %v379_v52 = vmul.f32 %v376_v33, %v361_v44  ;;  %v467_v61 = vmul.f32 %v466_v39, %v435_v38 }
 0x25b   :  { %v425_v49 = vadd.f32 %v421_v42, %v378_v41  ;;  %v389_v51 = vsel %vm385_vm8, %v384_v43, %v381_v34  ;;  %v436_v54 = vsel %vm432_vm9, %v431_v46, %v428_v36 }
 0x25c   :  { %v415_v53 = vsel %vm394_vm10, %v389_v51, 0.0  ;;  %v386_v55 = vsel %vm385_vm8, %v383_v47, %v384_v43  ;;  %v387_v56 = vsel %vm385_vm8, %v382_v29, %v383_v47  ;;  %v465_v58 = vsel %vm448_vm11, %v436_v54, 0.0 }
 0x25d   :  { %v420_v57 = vmul.f32 %v419_v35, %v415_v53  ;;  %v422_v59 = vmul.f32 %v419_v35, %v387_v56  ;;  %v423_v60 = vmul.f32 %v419_v35, %v386_v55  ;;  %v470_v62 = vmul.f32 %v466_v39, %v465_v58 }
 0x25e   :  { %v433_v63 = vsel %vm432_vm9, %v430_v48, %v431_v46  ;;  %v434_v0 = vsel %vm432_vm9, %v429_v30, %v430_v48 }
 0x25f   :  { %v424_v1 = vadd.f32 %v420_v57, %v377_v45  ;;  %v426_v2 = vadd.f32 %v422_v59, %v379_v52  ;;  %v427_v3 = vadd.f32 %v423_v60, %v380_v50  ;;  %v468_v4 = vmul.f32 %v466_v39, %v434_v0  ;;  %v539_v50 = vpop.permute.xlu1 %538  ;;  %v544_v52 = vpop.permute.xlu0 %543 }
 0x260   :  { %v469_v5 = vmul.f32 %v466_v39, %v433_v63 }
 0x261   :  { %v471_v6 = vadd.f32 %v467_v61, %v424_v1  ;;  %v472_v7 = vadd.f32 %v468_v4, %v425_v49  ;;  %v474_v8 = vadd.f32 %v470_v62, %v427_v3 }
 0x262   :  { %v473_v9 = vadd.f32 %v469_v5, %v426_v2 }
 0x263   :  { %v824_v10 = vmul.f32 -1.442695, %v471_v6  ;;  %v825_v11 = vmul.f32 -1.442695, %v472_v7  ;;  %v827_v13 = vmul.f32 -1.442695, %v474_v8  ;;  %v581_v51 = vpop.permute.xlu1 %580  ;;  %v586_v53 = vpop.permute.xlu0 %585 }
 0x264   :  { %v826_v12 = vmul.f32 -1.442695, %v473_v9 }
 0x265   :  { %985 = vpow2.f32 %v824_v10 }
 0x266   :  { %987 = vpow2.f32 %v825_v11 }
 0x267   :  { %989 = vpow2.f32 %v826_v12  ;;  %v596_v55 = vpop.permute.xlu0 %595 }
 0x268   :  { %991 = vpow2.f32 %v827_v13 }
 0x26b   :  { %v554_v57 = vpop.permute.xlu0 %553 }
 0x26f   :  { %v986_v14 = vpop.eup %985 }
 0x270   :  { %v988_v17 = vpop.eup %987  ;;  %v487_v18 = vadd.f32 1.0, %v986_v14 }
 0x271   :  { %v990_v19 = vpop.eup %989  ;;  %v488_v20 = vadd.f32 1.0, %v988_v17 }
 0x272   :  { %v992_v23 = vpop.eup %991  ;;  %v489_v25 = vadd.f32 1.0, %v990_v19  ;;  %993 = vrcp.f32 %v487_v18 }
 0x273   :  { %v490_v26 = vadd.f32 1.0, %v992_v23  ;;  %995 = vrcp.f32 %v488_v20 }
 0x274   :  { %997 = vrcp.f32 %v489_v25 }
 0x275   :  { %999 = vrcp.f32 %v490_v26 }
 0x27c   :  { %v994_v27 = vpop.eup %993 }
 0x27d   :  { %v996_v28 = vpop.eup %995 }
 0x27e   :  { %v499_v29 = vadd.f32 %v996_v28, %v994_v27  ;;  %v998_v30 = vpop.eup %997 }
 0x27f   :  { %v1000_v32 = vpop.eup %999 }
 0x280   :  { %v500_v31 = vadd.f32 %v998_v30, %v499_v29 }
 0x282   :  { %v501_v33 = vadd.f32 %v1000_v32, %v500_v31 }
 0x284   :  { %v502_v34 = vrot.slane %v501_v33, 4 }
 0x286   :  { %v503_v35 = vadd.f32 %v502_v34, %v501_v33 }
 0x288   :  { %v504_v36 = vrot.slane %v503_v35, 2 }
 0x28a   :  { %v505_v37 = vadd.f32 %v504_v36, %v503_v35 }
 0x28c   :  { %v506_v38 = vrot.slane %v505_v37, 1 }
 0x28e   :  { %v507_v39 = vadd.f32 %v506_v38, %v505_v37 }
 0x290   :  { %1001 = vrcp.f32 %v507_v39 }
 0x29a   :  { %v1002_v40 = vpop.eup %1001 }
 0x29b   :  { %v509_v41 = vmul.f32 32.0, %v1002_v40 }
 0x29d   :  { %v510_v42 = vmul.f32 %v994_v27, %v509_v41  ;;  %v512_v43 = vmul.f32 %v998_v30, %v509_v41  ;;  %v513_v44 = vmul.f32 %v1000_v32, %v509_v41  ;;  %v511_v45 = vmul.f32 %v996_v28, %v509_v41 }
 0x29f   :  { %v514_v46 = vmul.f32 %v510_v42, %v1253_v15  ;;  %v515_v47 = vmul.f32 %v511_v45, %v1255_v16  ;;  %v517_v48 = vmul.f32 %v513_v44, %v1261_v22  ;;  %v516_v49 = vmul.f32 %v512_v43, %v1259_v21  ;;  %v591_v15 = vpop.permute.xlu1 %590  ;;  %v612_v22 = vpop.permute.xlu0 %611 }
 0x2a0   :  { %v519_v21 = vand.u32 127, %v370_v24 }
 0x2a1   :  { %558 = vrot.lane.b32.xlu0 %v515_v47, %s1028_s0  ;;  %556 = vrot.lane.b32.xlu1 %v514_v46, %s1028_s0  ;;  %v623_v17 = vmul.f32 %v612_v22, %v515_v47 }
 0x2a2   :  { %v524_v60 = vand.u32 15, %v519_v21 }
 0x2a3   :  { %v549_v16 = vpop.permute.xlu1 %548  ;;  %v650_v59 = vpop.permute.xlu0 %649 }
 0x2a4   :  { %v564_v62 = vadd.s32 4294967295, %v524_v60  ;;  %v638_v6 = vadd.s32 1, %v524_v60 }
 0x2a5   :  { %562 = vrot.lane.b32.xlu0 %v517_v48, %s1028_s0  ;;  %560 = vrot.lane.b32.xlu1 %v516_v49, %s1028_s0 }
 0x2a6   :  { %vm565_vm12 = vcmp.ge.s32.totalorder %v564_v62, 0  ;;  %vm640_vm13 = vcmp.lt.s32.totalorder %v638_v6, 16 }
 0x2a7   :  { %v608_v54 = vpop.permute.xlu1 %607  ;;  %v662_v63 = vpop.permute.xlu0 %661 }
 0x2a8   :  { %v622_v19 = vmul.f32 %v608_v54, %v514_v46 }
 0x2a9   :  { %632 = vrot.lane.b32.xlu0 %v515_v47, %s1029_s30  ;;  %630 = vrot.lane.b32.xlu1 %v514_v46, %s1029_s30 }
 0x2ab   :  { %v616_v56 = vpop.permute.xlu1 %615 }
 0x2ac   :  { %v624_v35 = vmul.f32 %v616_v56, %v516_v49 }
 0x2ad   :  { %636 = vrot.lane.b32.xlu0 %v517_v48, %s1029_s30  ;;  %634 = vrot.lane.b32.xlu1 %v516_v49, %s1029_s30 }
 0x2af   :  { %v620_v58 = vpop.permute.xlu1 %619 }
 0x2b0   :  { %v625_v32 = vmul.f32 %v620_v58, %v517_v48 }
 0x2b3   :  { %v654_v61 = vpop.permute.xlu1 %653 }
 0x2b7   :  { %v658_v0 = vpop.permute.xlu1 %657 }
 0x313   :  { %v559_v1 = vpop.permute.xlu0 %558  ;;  %v557_v3 = vpop.permute.xlu1 %556 }
 0x314   :  { %v575_v2 = vsel %vm565_vm12, %v559_v1, 0.0  ;;  %v574_v5 = vsel %vm565_vm12, %v557_v3, 0.0 }
 0x315   :  { %v599_v4 = vmul.f32 %v586_v53, %v575_v2  ;;  %v598_v7 = vmul.f32 %v581_v51, %v574_v5 }
 0x317   :  { %v563_v8 = vpop.permute.xlu0 %562  ;;  %v561_v10 = vpop.permute.xlu1 %560  ;;  %v603_v11 = vadd.f32 %v599_v4, %v544_v52  ;;  %v602_v13 = vadd.f32 %v598_v7, %v539_v50 }
 0x318   :  { %v577_v9 = vsel %vm565_vm12, %v563_v8, 0.0  ;;  %v576_v12 = vsel %vm565_vm12, %v561_v10, 0.0 }
 0x319   :  { %v601_v24 = vmul.f32 %v596_v55, %v577_v9  ;;  %v600_v14 = vmul.f32 %v591_v15, %v576_v12  ;;  %v627_v26 = vadd.f32 %v623_v17, %v603_v11  ;;  %v626_v30 = vadd.f32 %v622_v19, %v602_v13 }
 0x31b   :  { %v633_v18 = vpop.permute.xlu0 %632  ;;  %v631_v23 = vpop.permute.xlu1 %630  ;;  %v605_v25 = vadd.f32 %v601_v24, %v554_v57  ;;  %v604_v29 = vadd.f32 %v600_v14, %v549_v16 }
 0x31c   :  { %v645_v20 = vsel %vm640_vm13, %v633_v18, 0.0  ;;  %v644_v28 = vsel %vm640_vm13, %v631_v23, 0.0 }
 0x31d   :  { %v665_v27 = vmul.f32 %v654_v61, %v645_v20  ;;  %v664_v31 = vmul.f32 %v650_v59, %v644_v28  ;;  %v629_v39 = vadd.f32 %v625_v32, %v605_v25  ;;  %v628_v42 = vadd.f32 %v624_v35, %v604_v29 }
 0x31f   :  { %v669_v33 = vadd.f32 %v665_v27, %v627_v26  ;;  %v637_v34 = vpop.permute.xlu0 %636  ;;  %v668_v36 = vadd.f32 %v664_v31, %v626_v30  ;;  %v635_v38 = vpop.permute.xlu1 %634 }
 0x320   :  { %v647_v37 = vsel %vm640_vm13, %v637_v34, 0.0  ;;  %v646_v41 = vsel %vm640_vm13, %v635_v38, 0.0 }
 0x321   :  { %673 = vst.msk [vmem:[%s1450_s7 + $0x8] sm:$0xff] %vm41_vm0, %v669_v33  ;;  %v667_v40 = vmul.f32 %v662_v63, %v647_v37  ;;  %682 = vrot.lane.b32.xlu0 %v669_v33, %s1024_s24  ;;  %672 = vst.msk [vmem:[%s1450_s7] sm:$0xff] %vm41_vm0, %v668_v36  ;;  %v666_v43 = vmul.f32 %v658_v0, %v646_v41  ;;  %680 = vrot.lane.b32.xlu1 %v668_v36, %s1024_s24 }
 0x323   :  { %v671_v44 = vadd.f32 %v667_v40, %v629_v39  ;;  %v670_v45 = vadd.f32 %v666_v43, %v628_v42 }
 0x325   :  { %675 = vst.msk [vmem:[%s1450_s7 + $0x18] sm:$0xff] %vm41_vm0, %v671_v44  ;;  %686 = vrot.lane.b32.xlu0 %v671_v44, %s1024_s24  ;;  %674 = vst.msk [vmem:[%s1450_s7 + $0x10] sm:$0xff] %vm41_vm0, %v670_v45  ;;  %684 = vrot.lane.b32.xlu1 %v670_v45, %s1024_s24 }
 0x329   :  { %699 = vrot.lane.b32.xlu0 %v669_v33, %s1023_s16  ;;  %697 = vrot.lane.b32.xlu1 %v668_v36, %s1023_s16 }
 0x32d   :  { %703 = vrot.lane.b32.xlu0 %v671_v44, %s1023_s16  ;;  %701 = vrot.lane.b32.xlu1 %v670_v45, %s1023_s16 }
 0x331   :  { %716 = vrot.lane.b32.xlu0 %v669_v33, %s1022_s11  ;;  %714 = vrot.lane.b32.xlu1 %v668_v36, %s1022_s11 }
 0x335   :  { %720 = vrot.lane.b32.xlu0 %v671_v44, %s1022_s11  ;;  %718 = vrot.lane.b32.xlu1 %v670_v45, %s1022_s11 }
 0x339   :  { %733 = vrot.lane.b32.xlu0 %v669_v33, %s1021_s28  ;;  %731 = vrot.lane.b32.xlu1 %v668_v36, %s1021_s28 }
 0x33d   :  { %737 = vrot.lane.b32.xlu0 %v671_v44, %s1021_s28  ;;  %735 = vrot.lane.b32.xlu1 %v670_v45, %s1021_s28 }
 0x341   :  { %750 = vrot.lane.b32.xlu0 %v669_v33, %s1020_s23  ;;  %748 = vrot.lane.b32.xlu1 %v668_v36, %s1020_s23 }
 0x345   :  { %754 = vrot.lane.b32.xlu0 %v671_v44, %s1020_s23  ;;  %752 = vrot.lane.b32.xlu1 %v670_v45, %s1020_s23 }
 0x349   :  { %767 = vrot.lane.b32.xlu0 %v669_v33, %s1018_s3  ;;  %765 = vrot.lane.b32.xlu1 %v668_v36, %s1018_s3 }
 0x34d   :  { %771 = vrot.lane.b32.xlu0 %v671_v44, %s1018_s3  ;;  %769 = vrot.lane.b32.xlu1 %v670_v45, %s1018_s3 }
 0x351   :  { %784 = vrot.lane.b32.xlu0 %v669_v33, %s1019_s10  ;;  %782 = vrot.lane.b32.xlu1 %v668_v36, %s1019_s10 }
 0x355   :  { %788 = vrot.lane.b32.xlu0 %v671_v44, %s1019_s10  ;;  %786 = vrot.lane.b32.xlu1 %v670_v45, %s1019_s10 }
 0x393   :  { %v683_v46 = vpop.permute.xlu0 %682  ;;  %v681_v47 = vpop.permute.xlu1 %680 }
 0x394   :  { %829 = vst.msk [vmem:[%s1450_s7 + $0x28] sm:$0xff] %vm41_vm0, %v683_v46  ;;  %828 = vst.msk [vmem:[%s1450_s7 + $0x20] sm:$0xff] %vm41_vm0, %v681_v47 }
 0x397   :  { %v687_v48 = vpop.permute.xlu0 %686  ;;  %v685_v49 = vpop.permute.xlu1 %684 }
 0x398   :  { %831 = vst.msk [vmem:[%s1450_s7 + $0x38] sm:$0xff] %vm41_vm0, %v687_v48  ;;  %830 = vst.msk [vmem:[%s1450_s7 + $0x30] sm:$0xff] %vm41_vm0, %v685_v49 }
 0x39b   :  { %v700_v50 = vpop.permute.xlu0 %699  ;;  %v698_v51 = vpop.permute.xlu1 %697 }
 0x39c   :  { %833 = vst.msk [vmem:[%s1450_s7 + $0x48] sm:$0xff] %vm41_vm0, %v700_v50  ;;  %832 = vst.msk [vmem:[%s1450_s7 + $0x40] sm:$0xff] %vm41_vm0, %v698_v51 }
 0x39f   :  { %v704_v52 = vpop.permute.xlu0 %703  ;;  %v702_v15 = vpop.permute.xlu1 %701 }
 0x3a0   :  { %835 = vst.msk [vmem:[%s1450_s7 + $0x58] sm:$0xff] %vm41_vm0, %v704_v52  ;;  %834 = vst.msk [vmem:[%s1450_s7 + $0x50] sm:$0xff] %vm41_vm0, %v702_v15 }
 0x3a3   :  { %v717_v53 = vpop.permute.xlu0 %716  ;;  %v715_v16 = vpop.permute.xlu1 %714 }
 0x3a4   :  { %837 = vst.msk [vmem:[%s1450_s7 + $0x68] sm:$0xff] %vm41_vm0, %v717_v53  ;;  %836 = vst.msk [vmem:[%s1450_s7 + $0x60] sm:$0xff] %vm41_vm0, %v715_v16 }
 0x3a7   :  { %v721_v54 = vpop.permute.xlu0 %720  ;;  %v719_v55 = vpop.permute.xlu1 %718 }
 0x3a8   :  { %839 = vst.msk [vmem:[%s1450_s7 + $0x78] sm:$0xff] %vm41_vm0, %v721_v54  ;;  %838 = vst.msk [vmem:[%s1450_s7 + $0x70] sm:$0xff] %vm41_vm0, %v719_v55 }
 0x3ab   :  { %v734_v56 = vpop.permute.xlu0 %733  ;;  %v732_v57 = vpop.permute.xlu1 %731 }
 0x3ac   :  { %841 = vst.msk [vmem:[%s1450_s7 + $0x88] sm:$0xff] %vm41_vm0, %v734_v56  ;;  %840 = vst.msk [vmem:[%s1450_s7 + $0x80] sm:$0xff] %vm41_vm0, %v732_v57 }
 0x3af   :  { %v738_v22 = vpop.permute.xlu0 %737  ;;  %v736_v21 = vpop.permute.xlu1 %735 }
 0x3b0   :  { %843 = vst.msk [vmem:[%s1450_s7 + $0x98] sm:$0xff] %vm41_vm0, %v738_v22  ;;  %842 = vst.msk [vmem:[%s1450_s7 + $0x90] sm:$0xff] %vm41_vm0, %v736_v21 }
 0x3b3   :  { %v751_v58 = vpop.permute.xlu0 %750  ;;  %v749_v59 = vpop.permute.xlu1 %748 }
 0x3b4   :  { %845 = vst.msk [vmem:[%s1450_s7 + $0xa8] sm:$0xff] %vm41_vm0, %v751_v58  ;;  %844 = vst.msk [vmem:[%s1450_s7 + $0xa0] sm:$0xff] %vm41_vm0, %v749_v59 }
 0x3b7   :  { %v755_v60 = vpop.permute.xlu0 %754  ;;  %v753_v61 = vpop.permute.xlu1 %752 }
 0x3b8   :  { %847 = vst.msk [vmem:[%s1450_s7 + $0xb8] sm:$0xff] %vm41_vm0, %v755_v60  ;;  %846 = vst.msk [vmem:[%s1450_s7 + $0xb0] sm:$0xff] %vm41_vm0, %v753_v61 }
 0x3bb   :  { %v768_v62 = vpop.permute.xlu0 %767  ;;  %v766_v63 = vpop.permute.xlu1 %765 }
 0x3bc   :  { %849 = vst.msk [vmem:[%s1450_s7 + $0xc8] sm:$0xff] %vm41_vm0, %v768_v62  ;;  %848 = vst.msk [vmem:[%s1450_s7 + $0xc0] sm:$0xff] %vm41_vm0, %v766_v63 }
 0x3bf   :  { %v772_v0 = vpop.permute.xlu0 %771  ;;  %v770_v1 = vpop.permute.xlu1 %769 }
 0x3c0   :  { %851 = vst.msk [vmem:[%s1450_s7 + $0xd8] sm:$0xff] %vm41_vm0, %v772_v0  ;;  %850 = vst.msk [vmem:[%s1450_s7 + $0xd0] sm:$0xff] %vm41_vm0, %v770_v1 }
 0x3c3   :  { %v785_v2 = vpop.permute.xlu0 %784  ;;  %v783_v3 = vpop.permute.xlu1 %782 }
 0x3c4   :  { %853 = vst.msk [vmem:[%s1450_s7 + $0xe8] sm:$0xff] %vm41_vm0, %v785_v2  ;;  %852 = vst.msk [vmem:[%s1450_s7 + $0xe0] sm:$0xff] %vm41_vm0, %v783_v3 }
 0x3c7   :  { %v789_v4 = vpop.permute.xlu0 %788  ;;  %v787_v5 = vpop.permute.xlu1 %786 }
 0x3c8   :  { %855 = vst.msk [vmem:[%s1450_s7 + $0xf8] sm:$0xff] %vm41_vm0, %v789_v4  ;;  %854 = vst.msk [vmem:[%s1450_s7 + $0xf0] sm:$0xff] %vm41_vm0, %v787_v5 }
 0x3c9   :  { %803 = vsyncpa [#allocation4], 1 }

</bundles_post_ra>
